<compile_context>
chip_gen: v5e
topology: v5e:2x2
jax: 0.10.0
libtpu: 0.0.40
codegen_flags: <defaults>
</compile_context>

<pallas_src>
import functools

import jax
import jax.numpy as jnp
from jax import lax
from jax.experimental import pallas as pl
from jax.experimental.pallas import tpu as pltpu

_LANE = 128          # pad D and R up to a multiple of the lane width
_SUBLANE = 8         # sequence tiles must be a multiple of the sublane width
_TQ_CAP = 256
_WEIGHT_SINGLE_BUFFER_MIN_BYTES = 1 << 20   # single-buffer weights >= 1 MiB/copy


def _round_up(x, m):
    return ((x + m - 1) // m) * m


def _tpu_vmem_capacity_bytes():
    """Physical VMEM per core (64 MiB on v7x, 128 MiB on v5e/v6e)."""
    try:
        cap = int(pltpu.get_tpu_info().vmem_capacity_bytes)
        if cap > 0:
            return cap
    except Exception:
        pass
    return 64 * 1024 * 1024   # conservative fallback (v7x-sized)


def _attn_vmem_bytes(tq, tk, dp, rp, itemsize, kv_bufs, w_bufs):
    return (2 * tq * dp * itemsize            # q blocks (double-buffered)
            + 2 * tq * dp * itemsize          # output blocks
            + kv_bufs * 2 * tk * rp * itemsize  # kp, vp blocks
            + w_bufs * 2 * dp * rp * itemsize   # wq, wo
            + tq * rp * 4                     # f32 rank-space accumulator
            + tq * rp * itemsize              # hoisted Q projection scratch
            + 2 * tq * _LANE * 4)             # running max / sum (lane-padded)


def _proj_vmem_bytes(t, dp, rp, itemsize, w_bufs):
    return (2 * 2 * t * dp * itemsize         # k, v input blocks
            + 2 * 2 * t * rp * itemsize       # kp, vp output blocks
            + w_bufs * 2 * dp * rp * itemsize)  # wk, wv


def _pick_proj_tile(skp, dp, rp, itemsize, w_bufs, budget):
    """Largest multiple of 8 that divides skp, fits the budget, <= 512."""
    cap = max((min(512, skp) // _SUBLANE) * _SUBLANE, _SUBLANE)
    while cap > _SUBLANE and _proj_vmem_bytes(cap, dp, rp, itemsize, w_bufs) > budget:
        cap = _round_up(max(cap // 2, _SUBLANE), _SUBLANE)
    d = cap
    while d > _SUBLANE and skp % d != 0:
        d -= _SUBLANE
    return d                                   # skp is a multiple of 8 -> >= 8


def _weight_spec(shape, index_map, single_buffer):
    # Grid-invariant weight block.  Only single-buffer when the double-buffer
    # waste is worth reclaiming; otherwise keep the default pipelining path.
    if single_buffer:
        return pl.BlockSpec(shape, index_map, pipeline_mode=pl.Buffered(1))
    return pl.BlockSpec(shape, index_map)


# --------------------------------------------------------------------------
# Prologue: project K and V into rank space once (K~, V~ of shape (B, Sk, Rp)).
# --------------------------------------------------------------------------
def _project_kv_kernel(k_ref, v_ref, wk_ref, wv_ref, kp_ref, vp_ref):
    c_lf = (((1,), (0,)), ((), ()))            # (m,k) @ (k,n)
    kp_ref[0] = lax.dot_general(k_ref[0], wk_ref[...], c_lf,
                                preferred_element_type=jnp.float32
                                ).astype(kp_ref.dtype)
    vp_ref[0] = lax.dot_general(v_ref[0], wv_ref[...], c_lf,
                                preferred_element_type=jnp.float32
                                ).astype(vp_ref.dtype)


# --------------------------------------------------------------------------
# Fused attention kernel (flash-style online softmax in rank space).
# --------------------------------------------------------------------------
def _low_rank_attn_kernel(q_ref, kp_ref, vp_ref, wq_ref, wo_ref, o_ref,
                          m_sc, l_sc, acc_sc, qp_sc, *,
                          tk, sk_valid, sk_padded):
    ki = pl.program_id(2)
    c_lf = (((1,), (0,)), ((), ()))            # (m,k) @ (k,n)
    c_ll = (((1,), (1,)), ((), ()))            # (m,k) @ (n,k) -- no K transpose

    # First key tile of each (b, q-tile): reset online-softmax state and
    # project Q into rank space ONCE (hoisted out of the key loop; the
    # 1/sqrt(rank) scale is already folded into wq wrapper-side).
    @pl.when(ki == 0)
    def _():
        m_sc[...] = jnp.full_like(m_sc, -jnp.inf)
        l_sc[...] = jnp.zeros_like(l_sc)
        acc_sc[...] = jnp.zeros_like(acc_sc)
        qp = lax.dot_general(q_ref[0], wq_ref[...], c_lf,
                             preferred_element_type=jnp.float32)
        qp_sc[...] = qp.astype(qp_sc.dtype)

    kp = kp_ref[0]                             # (tk, Rp) MXU operand dtype
    vp = vp_ref[0]

    # Scores: contract both operands on their last (rank) dim.
    s = lax.dot_general(qp_sc[...], kp, c_ll,
                        preferred_element_type=jnp.float32)       # (tq, tk) f32

    if sk_padded != sk_valid:                  # static: traced only if keys padded
        key_idx = ki * tk + lax.broadcasted_iota(jnp.int32, s.shape, 1)
        s = jnp.where(key_idx < sk_valid, s, -jnp.inf)

    # Online softmax update -- kept in f32 on the VPU/EUP.
    m_prev = m_sc[...]
    m_new = jnp.maximum(m_prev, jnp.max(s, axis=-1, keepdims=True))
    alpha = jnp.exp(m_prev - m_new)
    p = jnp.exp(s - m_new)
    l_sc[...] = alpha * l_sc[...] + jnp.sum(p, axis=-1, keepdims=True)
    acc_sc[...] = alpha * acc_sc[...] + lax.dot_general(
        p.astype(vp.dtype), vp, c_lf, preferred_element_type=jnp.float32)
    m_sc[...] = m_new

    # Last key tile: normalize (EUP approx reciprocal) and apply the output
    # projection.  NOTE: relies on the output index_map being ki-invariant so
    # o_ref stays resident across the (arbitrary) key axis.
    @pl.when(ki == pl.num_programs(2) - 1)
    def _():
        av = acc_sc[...] * pl.reciprocal(l_sc[...], approx=True)   # (tq, Rp)
        out = lax.dot_general(av.astype(wo_ref.dtype), wo_ref[...], c_lf,
                              preferred_element_type=jnp.float32)  # (tq, Dp)
        o_ref[0] = out.astype(o_ref.dtype)


# --------------------------------------------------------------------------
# Wrapper
# --------------------------------------------------------------------------
def low_rank_attention(q, k, v, wq, wk, wv, wo):
    """q: (B,Sq,D), k/v: (B,Sk,D), wq/wk/wv: (D,R) (x @ W layout), wo: (R,D)."""
    B, Sq, D = q.shape
    Sk = k.shape[1]
    R = wq.shape[1]
    dtype = q.dtype
    itemsize = jnp.dtype(dtype).itemsize

    # Fold 1/sqrt(rank) into wq once (weight, not activation, so the
    # "wrapper pre-scale" anti-pattern doesn't apply).  Uses the ORIGINAL rank.
    scale = 1.0 / (R ** 0.5)
    wq = (wq.astype(jnp.float32) * scale).astype(dtype)

    # --- lane padding of feature (D) / rank (R) dims: exact (zero padding) ---
    # R is padded to the next multiple of 128 and no further (over-padding is
    # pure zero-FLOPs on the MXU).
    Dp = _round_up(D, _LANE)
    Rp = _round_up(R, _LANE)
    if Dp != D:
        pd = Dp - D
        q = jnp.pad(q, ((0, 0), (0, 0), (0, pd)))
        k = jnp.pad(k, ((0, 0), (0, 0), (0, pd)))
        v = jnp.pad(v, ((0, 0), (0, 0), (0, pd)))
        wq = jnp.pad(wq, ((0, pd), (0, 0)))
        wk = jnp.pad(wk, ((0, pd), (0, 0)))
        wv = jnp.pad(wv, ((0, pd), (0, 0)))
        wo = jnp.pad(wo, ((0, 0), (0, pd)))
    if Rp != R:
        pr = Rp - R
        wq = jnp.pad(wq, ((0, 0), (0, pr)))
        wk = jnp.pad(wk, ((0, 0), (0, pr)))
        wv = jnp.pad(wv, ((0, 0), (0, pr)))
        wo = jnp.pad(wo, ((0, pr), (0, 0)))

    # --- generation-aware VMEM budget ----------------------------------------
    vmem_cap = _tpu_vmem_capacity_bytes()
    vmem_limit = (vmem_cap * 3) // 4          # 48 MiB on v7x, 96 MiB on v5e/v6e
    budget = int(vmem_limit * 0.85)           # headroom for compiler internals

    single_buffer_w = Dp * Rp * itemsize >= _WEIGHT_SINGLE_BUFFER_MIN_BYTES
    w_bufs = 1 if single_buffer_w else 2

    # --- attention tiling ------------------------------------------------------
    tq = min(_TQ_CAP, _round_up(Sq, _SUBLANE))
    tk_cap = 1024 if vmem_cap >= (96 << 20) else 512   # K/V blocks are only tk*Rp
    tk = min(tk_cap, _round_up(Sk, _SUBLANE))
    while _attn_vmem_bytes(tq, tk, Dp, Rp, itemsize, 3, w_bufs) > budget:
        if tq > _SUBLANE:
            tq = _round_up(max(tq // 2, _SUBLANE), _SUBLANE)
        elif tk > _SUBLANE:
            tk = _round_up(max(tk // 2, _SUBLANE), _SUBLANE)
        else:
            break

    Sqp = _round_up(Sq, tq)
    nq = Sqp // tq
    # Megacore occupancy: ensure >= 2 parallel (b, q-tile) units when possible.
    if B * nq < 2 and tq > _SUBLANE:
        tq = _round_up(max((Sq + 1) // 2, _SUBLANE), _SUBLANE)
        Sqp = _round_up(Sq, tq)
        nq = Sqp // tq

    Skp = _round_up(Sk, tk)
    nk = Skp // tk
    kv_bufs = 3 if nk >= 3 else 2   # deepen the K/V pipeline when the loop is long

    # --- sequence padding (padded keys are masked with -inf in-kernel) --------
    if Sqp != Sq:
        q = jnp.pad(q, ((0, 0), (0, Sqp - Sq), (0, 0)))
    if Skp != Sk:
        k = jnp.pad(k, ((0, 0), (0, Skp - Sk), (0, 0)))
        v = jnp.pad(v, ((0, 0), (0, Skp - Sk), (0, 0)))

    # --- prologue: project K, V into rank space once --------------------------
    tproj = _pick_proj_tile(Skp, Dp, Rp, itemsize, w_bufs, budget)
    w_proj_spec = _weight_spec((Dp, Rp), lambda b, i: (0, 0), single_buffer_w)
    kp, vp = pl.pallas_call(
        _project_kv_kernel,
        out_shape=(jax.ShapeDtypeStruct((B, Skp, Rp), dtype),
                   jax.ShapeDtypeStruct((B, Skp, Rp), dtype)),
        grid_spec=pltpu.PrefetchScalarGridSpec(
            num_scalar_prefetch=0,
            grid=(B, Skp // tproj),
            in_specs=[pl.BlockSpec((1, tproj, Dp), lambda b, i: (b, i, 0)),
                      pl.BlockSpec((1, tproj, Dp), lambda b, i: (b, i, 0)),
                      w_proj_spec, w_proj_spec],
            out_specs=[pl.BlockSpec((1, tproj, Rp), lambda b, i: (b, i, 0)),
                       pl.BlockSpec((1, tproj, Rp), lambda b, i: (b, i, 0))],
        ),
        compiler_params=pltpu.CompilerParams(
            dimension_semantics=("parallel", "parallel"),
            vmem_limit_bytes=vmem_limit),
    )(k, v, wk, wv)

    # --- fused attention -------------------------------------------------------
    kernel = functools.partial(_low_rank_attn_kernel,
                               tk=tk, sk_valid=Sk, sk_padded=Skp)

    q_spec = pl.BlockSpec((1, tq, Dp), lambda b, qi, ki: (b, qi, 0))
    kv_map = lambda b, qi, ki: (b, ki, 0)
    if kv_bufs != 2:
        kv_spec = pl.BlockSpec((1, tk, Rp), kv_map,
                               pipeline_mode=pl.Buffered(kv_bufs))
    else:
        kv_spec = pl.BlockSpec((1, tk, Rp), kv_map)
    wq_spec = _weight_spec((Dp, Rp), lambda b, qi, ki: (0, 0), single_buffer_w)
    wo_spec = _weight_spec((Rp, Dp), lambda b, qi, ki: (0, 0), single_buffer_w)

    out = pl.pallas_call(
        kernel,
        out_shape=jax.ShapeDtypeStruct((B, Sqp, Dp), dtype),
        grid_spec=pltpu.PrefetchScalarGridSpec(
            num_scalar_prefetch=0,
            grid=(B, nq, nk),                         # reduction (key) axis last
            in_specs=[q_spec, kv_spec, kv_spec, wq_spec, wo_spec],
            out_specs=q_spec,
            scratch_shapes=[
                pltpu.VMEM((tq, 1), jnp.float32),     # running max
                pltpu.VMEM((tq, 1), jnp.float32),     # running sum
                pltpu.VMEM((tq, Rp), jnp.float32),    # rank-space accumulator
                pltpu.VMEM((tq, Rp), dtype),          # hoisted Q projection
            ],
        ),
        compiler_params=pltpu.CompilerParams(
            dimension_semantics=("parallel", "parallel", "arbitrary"),
            vmem_limit_bytes=vmem_limit),
    )(q, kp, vp, wq, wo)

    if Sqp != Sq or Dp != D:
        out = out[:, :Sq, :D]
    return out


# --------------------------------------------------------------------------
# Reference + tests
# --------------------------------------------------------------------------
def reference_jax(q, k, v, wq, wk, wv, wo, rank):
    Q = q @ wq
    K = k @ wk
    V = v @ wv
    A = jnp.einsum("bqr,bkr->bqk", Q, K) / (rank ** 0.5)
    A = jax.nn.softmax(A, axis=-1)
    AV = jnp.einsum("bqk,bkr->bqr", A, V)
    return AV @ wo


if __name__ == "__main__":
    key = jax.random.PRNGKey(0)

    def init_linear(key, fan_in, shape):
        bound = 1.0 / (fan_in ** 0.5)
        return jax.random.uniform(key, shape, jnp.float32, -bound, bound)

    def make_inputs(key, B, Sq, Sk, dim, rank):
        kq, kk, kv, kwq, kwk, kwv, kwo = jax.random.split(key, 7)
        q = jax.random.normal(kq, (B, Sq, dim), dtype=jnp.float32)
        k = jax.random.normal(kk, (B, Sk, dim), dtype=jnp.float32)
        v = jax.random.normal(kv, (B, Sk, dim), dtype=jnp.float32)
        # nn.Linear(in, out, bias=False).weight is (out, in); store the
        # transpose so the kernels compute x @ W directly.
        wq = init_linear(kwq, dim, (dim, rank))
        wk = init_linear(kwk, dim, (dim, rank))
        wv = init_linear(kwv, dim, (dim, rank))
        wo = init_linear(kwo, rank, (rank, dim))
        return q, k, v, wq, wk, wv, wo

    B, S, DIM, RANK = 2, 8, 32, 16
    k1, k2 = jax.random.split(key)

    # f32, aligned small shapes (matches the module's math up to the approx
    # reciprocal + online softmax).
    args = make_inputs(k1, B, S, S, DIM, RANK)
    ref = reference_jax(*args, RANK)
    out = jax.block_until_ready(low_rank_attention(*args))
    assert out.shape == (B, S, DIM)
    assert jnp.allclose(out, ref, atol=5e-3, rtol=5e-3), (
        float(jnp.max(jnp.abs(out - ref))))

    # bf16 operands (fast MXU path on all generations); softmax stays f32.
    bf = lambda x: x.astype(jnp.bfloat16)
    out16 = low_rank_attention(*(bf(a) for a in args))
    out16 = jax.block_until_ready(out16).astype(jnp.float32)
    assert out16.shape == (B, S, DIM)
    assert jnp.allclose(out16, ref, atol=6e-2, rtol=6e-2), (
        float(jnp.max(jnp.abs(out16 - ref))))

    # Ragged Sq/Sk: exercises sequence padding, in-kernel key masking and the
    # megacore query-tile split.
    args3 = make_inputs(k2, 1, 12, 20, DIM, RANK)
    ref3 = reference_jax(*args3, RANK)
    out3 = jax.block_until_ready(low_rank_attention(*args3))
    assert out3.shape == (1, 12, DIM)
    assert jnp.allclose(out3, ref3, atol=5e-3, rtol=5e-3), (
        float(jnp.max(jnp.abs(out3 - ref3))))

    print("KERNEL_OK")
</pallas_src>

<mosaic_0001>
module attributes {stable_mosaic.version = 11 : i64} {
  func.func @_project_kv_kernel(%arg0: i32, %arg1: i32, %arg2: memref<1x8x128xf32, #tpu.memory_space<vmem>>, %arg3: memref<1x8x128xf32, #tpu.memory_space<vmem>>, %arg4: memref<128x128xf32, #tpu.memory_space<vmem>>, %arg5: memref<128x128xf32, #tpu.memory_space<vmem>>, %arg6: memref<1x8x128xf32, #tpu.memory_space<vmem>>, %arg7: memref<1x8x128xf32, #tpu.memory_space<vmem>>) attributes {dimension_semantics = [#tpu.dimension_semantics<parallel>, #tpu.dimension_semantics<parallel>], iteration_bounds = array<i64: 2, 1>, scalar_prefetch = 0 : i64, scratch_operands = 0 : i64, tpu.core_type = #tpu.core_type<tc>, window_params = [{transform_indices = @transform_0, window_bounds = array<i64: 1, 8, 128>}, {transform_indices = @transform_1, window_bounds = array<i64: 1, 8, 128>}, {pipeline_mode = #tpu.pipeline_mode<synchronous>, transform_indices = @transform_2, window_bounds = array<i64: 128, 128>}, {pipeline_mode = #tpu.pipeline_mode<synchronous>, transform_indices = @transform_3, window_bounds = array<i64: 128, 128>}, {transform_indices = @transform_4, window_bounds = array<i64: 1, 8, 128>}, {transform_indices = @transform_5, window_bounds = array<i64: 1, 8, 128>}]} {
    %c0 = arith.constant 0 : index
    %c0_0 = arith.constant 0 : index
    %c0_1 = arith.constant 0 : index
    %0 = vector.load %arg2[%c0, %c0_0, %c0_1] : memref<1x8x128xf32, #tpu.memory_space<vmem>>, vector<1x8x128xf32>
    %1 = vector.shape_cast %0 : vector<1x8x128xf32> to vector<8x128xf32>
    %c0_2 = arith.constant 0 : index
    %c0_3 = arith.constant 0 : index
    %2 = vector.load %arg4[%c0_2, %c0_3] : memref<128x128xf32, #tpu.memory_space<vmem>>, vector<128x128xf32>
    %cst = arith.constant dense<0.000000e+00> : vector<8x128xf32>
    %3 = tpu.matmul %1, %2, %cst {dimension_numbers = #tpu.dot_dimension_numbers<[1], [0], [0], [1], [0, 0, 1, 1], [], []>} : vector<8x128xf32>, vector<128x128xf32>, vector<8x128xf32> -> vector<8x128xf32>
    %c0_4 = arith.constant 0 : index
    %c0_5 = arith.constant 0 : index
    %c0_6 = arith.constant 0 : index
    %4 = vector.load %arg6[%c0_4, %c0_5, %c0_6] : memref<1x8x128xf32, #tpu.memory_space<vmem>>, vector<1x8x128xf32>
    %5 = vector.shape_cast %4 : vector<1x8x128xf32> to vector<8x128xf32>
    %6 = vector.shape_cast %3 : vector<8x128xf32> to vector<1x8x128xf32>
    tpu.vector_store %arg6[%c0_4, %c0_5, %c0_6], %6 {strides = array<i32>} : memref<1x8x128xf32, #tpu.memory_space<vmem>>, vector<1x8x128xf32>,
    %c0_7 = arith.constant 0 : index
    %c0_8 = arith.constant 0 : index
    %c0_9 = arith.constant 0 : index
    %7 = vector.load %arg3[%c0_7, %c0_8, %c0_9] : memref<1x8x128xf32, #tpu.memory_space<vmem>>, vector<1x8x128xf32>
    %8 = vector.shape_cast %7 : vector<1x8x128xf32> to vector<8x128xf32>
    %c0_10 = arith.constant 0 : index
    %c0_11 = arith.constant 0 : index
    %9 = vector.load %arg5[%c0_10, %c0_11] : memref<128x128xf32, #tpu.memory_space<vmem>>, vector<128x128xf32>
    %cst_12 = arith.constant dense<0.000000e+00> : vector<8x128xf32>
    %10 = tpu.matmul %8, %9, %cst_12 {dimension_numbers = #tpu.dot_dimension_numbers<[1], [0], [0], [1], [0, 0, 1, 1], [], []>} : vector<8x128xf32>, vector<128x128xf32>, vector<8x128xf32> -> vector<8x128xf32>
    %c0_13 = arith.constant 0 : index
    %c0_14 = arith.constant 0 : index
    %c0_15 = arith.constant 0 : index
    %11 = vector.load %arg7[%c0_13, %c0_14, %c0_15] : memref<1x8x128xf32, #tpu.memory_space<vmem>>, vector<1x8x128xf32>
    %12 = vector.shape_cast %11 : vector<1x8x128xf32> to vector<8x128xf32>
    %13 = vector.shape_cast %10 : vector<8x128xf32> to vector<1x8x128xf32>
    tpu.vector_store %arg7[%c0_13, %c0_14, %c0_15], %13 {strides = array<i32>} : memref<1x8x128xf32, #tpu.memory_space<vmem>>, vector<1x8x128xf32>,
    return
  }
  func.func @transform_0(%arg0: i32, %arg1: i32) -> (i32, i32, i32) {
    %c0_i32 = arith.constant 0 : i32
    %c0_i32_0 = arith.constant 0 : i32
    return %arg0, %arg1, %c0_i32 : i32, i32, i32
  }
  func.func @transform_1(%arg0: i32, %arg1: i32) -> (i32, i32, i32) {
    %c0_i32 = arith.constant 0 : i32
    %c0_i32_0 = arith.constant 0 : i32
    return %arg0, %arg1, %c0_i32 : i32, i32, i32
  }
  func.func @transform_2(%arg0: i32, %arg1: i32) -> (i32, i32) {
    %c0_i32 = arith.constant 0 : i32
    %c0_i32_0 = arith.constant 0 : i32
    %c0_i32_1 = arith.constant 0 : i32
    return %c0_i32, %c0_i32_0 : i32, i32
  }
  func.func @transform_3(%arg0: i32, %arg1: i32) -> (i32, i32) {
    %c0_i32 = arith.constant 0 : i32
    %c0_i32_0 = arith.constant 0 : i32
    %c0_i32_1 = arith.constant 0 : i32
    return %c0_i32, %c0_i32_0 : i32, i32
  }
  func.func @transform_4(%arg0: i32, %arg1: i32) -> (i32, i32, i32) {
    %c0_i32 = arith.constant 0 : i32
    %c0_i32_0 = arith.constant 0 : i32
    return %arg0, %arg1, %c0_i32 : i32, i32, i32
  }
  func.func @transform_5(%arg0: i32, %arg1: i32) -> (i32, i32, i32) {
    %c0_i32 = arith.constant 0 : i32
    %c0_i32_0 = arith.constant 0 : i32
    return %arg0, %arg1, %c0_i32 : i32, i32, i32
  }
}

</mosaic_0001>

<bundles_post_ra>
// kernel: tpu_custom_call.1
= control target key start
LH: loop header
LB: loop body
LE: loop exit
PB: predicated region body
PF: predicated region fallthrough
CT: control target
= control target key end

     0   :  { %s1209_s0 = inlined_call_operand.hbm [shape: f32[2,8,128], index: 0, kind: input, shape index: {}]   ;;  %s1210_s1 = inlined_call_operand.hbm [shape: f32[2,8,128], index: 1, kind: input, shape index: {}]   ;;  %s1211_s2 = inlined_call_operand.hbm [shape: f32[128,128], index: 2, kind: input, shape index: {}]   ;;  %s1212_s3 = inlined_call_operand.hbm [shape: f32[128,128], index: 3, kind: input, shape index: {}]   ;;  %s1213_s4 = inlined_call_operand.hbm [shape: f32[2,8,128], index: 4, kind: output, shape index: {0}]   ;;  %s1214_s5 = inlined_call_operand.hbm [shape: f32[2,8,128], index: 5, kind: output, shape index: {1}]  }
   0x1   :  { %1218 = sst [smem:[#allocation23_spill]] %s1211_s2 }
   0x2   :  { %1219 = sst [smem:[#allocation24_spill]] %s1212_s3 }
   0x3   :  { %11 = vsyncpa [#allocation3], 0 }
   0x4   :  { %13 = vsyncpa [#allocation3 + $0x1], 0 }
   0x5   :  { %14 = vsyncpa [#allocation6], 0 }
   0x6   :  { %16 = vsyncpa [#allocation6 + $0x1], 0 }
   0x7   :  { %17 = vsyncpa [#allocation9], 0 }
   0x8   :  { %18 = vsyncpa [#allocation4], 0 }
   0x9   :  { %20 = vsyncpa [#allocation4 + $0x1], 0 }
   0xa   :  { %21 = vsyncpa [#allocation12], 0 }
   0xb   :  { %23 = vsyncpa [#allocation12 + $0x1], 0  ;;  %s1017_s18 = smov 0   ;;  %s1019_s19 = smov 0  }
   0xc   :  { %s1021_s20 = smov 0   ;;  %s1023_s21 = smov 0  }
   0xd   :  { %s1025_s22 = smov 0   ;;  %s1027_s23 = smov 0  }
   0xe LB: > { %1220 = sst [smem:[#allocation19_spill]] %s969_s20  ;;  %s1048_s24 = sadd.s32 4294967295, %s981_s23   ;;  %s981_s23 = sphi %s1027_s23, %s29_s23   ;;  %s977_s22 = sphi %s1025_s22, %s1234_s22   ;;  %s973_s21 = sphi %s1023_s21, %s1233_s21   ;;  %s969_s20 = sphi %s1021_s20, %s1232_s20   ;;  %s965_s19 = sphi %s1019_s19, %s1236_s19   ;;  %s961_s18 = sphi %s1017_s18, %s1235_s18  }
   0xf   : > { %1221 = sst [smem:[#allocation20_spill]] %s977_s22  ;;  %p619_p0 = scmp.ge.s32.totalorder %s981_s23, 1 }
  0x10   : > { %p64_p1 = scmp.eq.s32.totalorder %s1048_s24, 0  ;;  %p200_p2 = scmp.lt.s32.totalorder %s981_s23, 3 }
  0x11   : > { %s1222_s2 = sld [smem:[#allocation23_spill]]  ;;  %s983_s29 = smov [#allocation7]  }
  0x12   : > { %p1056_p3 = pnand %p619_p0, %p200_p2  ;;  %s213_s30 = sshll.u32 %s983_s29, 4  ;;  %s214_s30 = int_to_ptr.vmem [resolvable:$true] %s213_s30 }
  0x13   : > { %p622_p6 = scmp.ge.s32.totalorder %s981_s23, 2  ;;  %s1224_s3 = sld [smem:[#allocation24_spill]] }
  0x14   : > { %p656_p4 = pneg %p1056_p3  ;;  %s984_s9 = smov 128  }
  0x15   : > { %s985_s10 = smov 8   ;;  %s986_s11 = smov [#allocation8]  }
  0x16   : > { %p657_p5 = pnand %p656_p4, %p64_p1  ;;  %s227_s12 = sshll.u32 %s986_s11, 4  ;;  %s228_s12 = int_to_ptr.vmem [resolvable:$true] %s227_s12 }
  0x17   : > { %s211_s27 = sshll.u32 %s1222_s2, 4  ;;  %s618_s13 = sadd.s32 4294967294, %s981_s23   ;;  %s212_s27 = int_to_ptr.hbm [resolvable:$true] %s211_s27 }
  0x18   : > { %659 = dma.hbm_to_vmem [thread:$0]  (!%p657_p5), %s212_s27, 2048, %s214_s30, [#allocation6], %s984_s9, %s984_s9, %s985_s10  }
  0x19   : > { %s225_s8 = sshll.u32 %s1224_s3, 4  ;;  %s41_s14 = sadd.s32 1, %s977_s22  ;;  %s226_s8 = int_to_ptr.hbm [resolvable:$true] %s225_s8 }
  0x1a   : > { %662 = dma.hbm_to_vmem [thread:$0]  (!%p657_p5), %s226_s8, 2048, %s228_s12, [#allocation9], %s984_s9, %s984_s9, %s985_s10  }
  0x1b   : > { %p43_p7 = scmp.ge.s32.totalorder %s41_s14, 2  ;;  %s50_s15 = sadd.s32 1, %s969_s20 }
  0x1c   : > { %p57_p8 = scmp.ne.s32.totalorder %s969_s20, %s965_s19  ;;  %p58_p9 = scmp.eq.s32.totalorder %s981_s23, 0 }
  0x1d   : > { %s1238_s14 = smov (%p43_p7, %s41_s14), 0  ;;  %p63_p11 = scmp.ne.s32.totalorder %s965_s19, %s961_s18 }
  0x1e   : > { %1225 = sst [smem:[#allocation21_spill]] %s1238_s14  ;;  %p1076_p10 = por %p58_p9, %p57_p8 }
  0x1f   : > { %s45_s17 = ssub.s32 %s977_s22, %s1238_s14  ;;  %p159_p12 = scmp.eq.s32.totalorder %s1048_s24, 1 }
  0x20   : > { %p48_p13 = scmp.eq.s32.totalorder %s45_s17, 0  ;;  %p1087_p0 = por %p64_p1, %p63_p11 }
  0x21   : > { %p1091_p2 = por %p159_p12, %p57_p8  ;;  %p165_p4 = scmp.eq.s32.totalorder %s618_s13, 1 }
  0x22   : > { %s1096_s27 = scalar_select %p48_p13, %s969_s20, %s50_s15  }
  0x23   : > { %p1098_p5 = por %p165_p4, %p63_p11  ;;  %p679_p7 = scmp.lt.s32.totalorder %s981_s23, 2 }
  0x24   : > { %1229 = sst [smem:[#allocation22_spill]] %s1096_s27  ;;  %s241_s30 = sand.u32 1, %s969_s20  }
  0x25   : > { %s624_s6 = sshll.u32 %s977_s22, 3  ;;  %s623_s7 = sshll.u32 %s241_s30, 3 }
  0x26   : > { %s250_s10 = scalar_lea.hbm %s1209_s0, %s624_s6  ;;  %s245_s12 = scalar_lea.vmem [#allocation2], %s623_s7 }
  0x27   : > { %s252_s11 = sshll.u32 %s250_s10, 4  ;;  %s254_s17 = sshll.u32 %s245_s12, 4  ;;  %s253_s11 = int_to_ptr.hbm [resolvable:$true] %s252_s11  ;;  %s255_s17 = int_to_ptr.vmem [resolvable:$true] %s254_s17 }
  0x28   : > { %p664_p8 = pnand %p679_p7, %p1076_p10  ;;  %s270_s2 = scalar_lea.hbm %s1210_s1, %s624_s6 }
  0x29   : > { %s261_s3 = sand.u32 1, %s981_s23   ;;  %s242_s14 = scalar_lea.sflag [#allocation3], %s241_s30 }
  0x2a   : > { %666 = dma.hbm_to_vmem [thread:$0]  (!%p664_p8), %s253_s11, 128, %s255_s17, %s242_s14  }
  0x2b   : > { %s272_s22 = sshll.u32 %s270_s2, 4  ;;  %s265_s27 = scalar_lea.vmem [#allocation5], %s623_s7  ;;  %s273_s22 = int_to_ptr.hbm [resolvable:$true] %s272_s22 }
  0x2c   : > { %s274_s20 = sshll.u32 %s265_s27, 4  ;;  %s262_s8 = scalar_lea.sflag [#allocation6], %s261_s3  ;;  %s275_s20 = int_to_ptr.vmem [resolvable:$true] %s274_s20 }
  0x2d   : > { %669 = dma.hbm_to_vmem [thread:$0]  (!%p664_p8), %s273_s22, 128, %s275_s20, %s262_s8  }
  0x2e   : > { %283 = sbr.rel (%p1056_p3) target bundleno = 233 (0xe9), region = 36  ;;  %s1117_s16 = sand.u32 (!%p1056_p3), 1, %s965_s19  }
  0x2f   : > { %s1120_s6 = sshll.u32 (!%p1056_p3), %s1117_s16, 3  ;;  %s286_s14 = scalar_lea.sflag (!%p1056_p3), [#allocation3], %s1117_s16 }
  0x30   : > { %s289_s2 = scalar_lea.vmem (!%p1056_p3), [#allocation2], %s1120_s6 }
  0x33   : > { %936 = dma.done.wait (%p1087_p0), %s286_s14, 128  }
  0x34   : > { %938 = vsyncadd (%p1087_p0), %s286_s14, 4294967168  ;;  %s295_s3 = sand.u32 1, %s1048_s24   ;;  %s299_s22 = scalar_lea.vmem [#allocation5], %s1120_s6 }
  0x35   : > { %s296_s20 = scalar_lea.sflag [#allocation6], %s295_s3 }
  0x36   : > { %940 = dma.done.wait (%p1087_p0), %s296_s20, 128  }
  0x37   : > { %942 = vsyncadd (%p1087_p0), %s296_s20, 4294967168 }
  0x38   : > { %944 = dma.done.wait (%p64_p1), [#allocation6], 2048  }
  0x39   : > { %946 = vsyncadd (%p64_p1), [#allocation6], 4294965248 }
  0x3a   : > { %948 = dma.done.wait (%p64_p1), [#allocation9], 2048  }
  0x3b   : > { %950 = vsyncadd (%p64_p1), [#allocation9], 4294965248  ;;  %v363_v0 = vld [vmem:[#allocation7 + $0x78] sm:$0xff]  ;;  %v362_v2 = vld [vmem:[#allocation7 + $0x70] sm:$0xff]  ;;  %s636_s24 = sshll.u32 %s973_s21, 3  ;;  %s339_s10 = scalar_lea.vmem [#allocation10], %s1120_s6 }
  0x3c   : > { %v401_v1 = vld [vmem:[#allocation8 + $0x78] sm:$0xff]  ;;  %364 = vmatpush.msra.mxu0 %v363_v0  ;;  %v400_v3 = vld [vmem:[#allocation8 + $0x70] sm:$0xff]  ;;  %v361_v4 = vld [vmem:[#allocation7 + $0x68] sm:$0xff]  ;;  %s440_s27 = scalar_lea.hbm %s1213_s4, %s636_s24  ;;  %s455_s9 = scalar_lea.hbm %s1214_s5, %s636_s24 }
  0x3d   : > { %402 = vmatpush.msra.mxu1 %v401_v1  ;;  %v399_v5 = vld [vmem:[#allocation8 + $0x68] sm:$0xff]  ;;  %v360_v6 = vld [vmem:[#allocation7 + $0x60] sm:$0xff]  ;;  %v359_v8 = vld [vmem:[#allocation7 + $0x58] sm:$0xff]  ;;  %s442_s11 = sshll.u32 %s339_s10, 4  ;;  %s346_s12 = scalar_lea.vmem [#allocation11], %s1120_s6  ;;  %s443_s11 = int_to_ptr.vmem [resolvable:$true] %s442_s11 }
  0x3e   : > { %365 = vmatpush.msra.mxu0 %v362_v2  ;;  %v398_v7 = vld [vmem:[#allocation8 + $0x60] sm:$0xff]  ;;  %v397_v9 = vld [vmem:[#allocation8 + $0x58] sm:$0xff]  ;;  %v358_v10 = vld [vmem:[#allocation7 + $0x50] sm:$0xff]  ;;  %s1155_s17 = sshll.u32 %s346_s12, 4  ;;  %s444_s13 = sshll.u32 %s440_s27, 4  ;;  %s458_s17 = int_to_ptr.vmem [resolvable:$true] %s1155_s17  ;;  %s445_s13 = int_to_ptr.hbm [resolvable:$true] %s444_s13 }
  0x3f   : > { %403 = vmatpush.msra.mxu1 %v400_v3  ;;  %v396_v11 = vld [vmem:[#allocation8 + $0x50] sm:$0xff]  ;;  %v357_v12 = vld [vmem:[#allocation7 + $0x48] sm:$0xff]  ;;  %v356_v14 = vld [vmem:[#allocation7 + $0x40] sm:$0xff]  ;;  %s459_s15 = sshll.u32 %s455_s9, 4  ;;  %s424_s21 = scalar_lea.sflag [#allocation4], %s1117_s16  ;;  %s1158_s15 = int_to_ptr.hbm [resolvable:$true] %s459_s15 }
  0x40   : > { %366 = vmatpush.msra.mxu0 %v361_v4  ;;  %v395_v13 = vld [vmem:[#allocation8 + $0x48] sm:$0xff]  ;;  %v394_v15 = vld [vmem:[#allocation8 + $0x40] sm:$0xff]  ;;  %v355_v16 = vld [vmem:[#allocation7 + $0x38] sm:$0xff]  ;;  %s869_s8 = sshra.s32 %s445_s13, 4  ;;  %s875_s3 = scalar_lea.hbm %s1213_s4, 16  ;;  %s870_s8 = int_to_ptr.hbm [resolvable:$true] %s869_s8 }
  0x41   : > { %404 = vmatpush.msra.mxu1 %v399_v5  ;;  %v393_v17 = vld [vmem:[#allocation8 + $0x38] sm:$0xff]  ;;  %v354_v18 = vld [vmem:[#allocation7 + $0x30] sm:$0xff]  ;;  %v353_v20 = vld [vmem:[#allocation7 + $0x28] sm:$0xff]  ;;  %s871_s14 = scalar_lea.hbm %s870_s8, 8  ;;  %p876_p10 = scmp.lt.s32.totalorder %s870_s8, %s1213_s4 }
  0x42   : > { %367 = vmatpush.msra.mxu0 %v360_v6  ;;  %v392_v19 = vld [vmem:[#allocation8 + $0x30] sm:$0xff]  ;;  %v391_v21 = vld [vmem:[#allocation8 + $0x28] sm:$0xff]  ;;  %v352_v22 = vld [vmem:[#allocation7 + $0x20] sm:$0xff]  ;;  %p872_p1 = scmp.ne.s32.totalorder %s870_s8, %s871_s14  ;;  %p877_p11 = scmp.lt.s32.totalorder %s875_s3, %s871_s14 }
  0x43   : > { %405 = vmatpush.msra.mxu1 %v398_v7  ;;  %v390_v23 = vld [vmem:[#allocation8 + $0x20] sm:$0xff]  ;;  %v351_v24 = vld [vmem:[#allocation7 + $0x18] sm:$0xff]  ;;  %v350_v26 = vld [vmem:[#allocation7 + $0x10] sm:$0xff] }
  0x44   : > { %368 = vmatpush.msra.mxu0 %v359_v8  ;;  %v389_v25 = vld [vmem:[#allocation8 + $0x18] sm:$0xff]  ;;  %v388_v27 = vld [vmem:[#allocation8 + $0x10] sm:$0xff]  ;;  %v349_v28 = vld [vmem:[#allocation7 + $0x8] sm:$0xff]  ;;  %p873_p3 = pnand %p872_p1, %p1091_p2  ;;  %p878_p12 = por %p877_p11, %p876_p10 }
  0x45   : > { %406 = vmatpush.msra.mxu1 %v397_v9  ;;  %v387_v29 = vld [vmem:[#allocation8 + $0x8] sm:$0xff]  ;;  %v348_v30 = vld [vmem:[#allocation7] sm:$0xff]  ;;  %v385_v33 = vld [vmem:[%s299_s22] sm:$0xff] }
  0x46   : > { %369 = vmatpush.msra.mxu0 %v358_v10  ;;  %v386_v31 = vld [vmem:[#allocation8] sm:$0xff]  ;;  %p874_p9 = pneg %p873_p3 }
  0x47   : > { %407 = vmatpush.msra.mxu1 %v396_v11  ;;  %v347_v32 = vld [vmem:[%s289_s2] sm:$0xff] }
  0x48   : > { %370 = vmatpush.msra.mxu0 %v357_v12  ;;  %p879_p13 = pnand %p878_p12, %p874_p9 }
  0x49   : > { %408 = vmatpush.msra.mxu1 %v395_v13 }
  0x4a   : > { %371 = vmatpush.msra.mxu0 %v356_v14 }
  0x4b   : > { %409 = vmatpush.msra.mxu1 %v394_v15 }
  0x4c   : > { %372 = vmatpush.msra.mxu0 %v355_v16 }
  0x4d   : > { %410 = vmatpush.msra.mxu1 %v393_v17 }
  0x4e   : > { %373 = vmatpush.msra.mxu0 %v354_v18 }
  0x4f   : > { %411 = vmatpush.msra.mxu1 %v392_v19 }
  0x50   : > { %374 = vmatpush.msra.mxu0 %v353_v20 }
  0x51   : > { %412 = vmatpush.msra.mxu1 %v391_v21 }
  0x52   : > { %375 = vmatpush.msra.mxu0 %v352_v22 }
  0x53   : > { %413 = vmatpush.msra.mxu1 %v390_v23 }
  0x54   : > { %376 = vmatpush.msra.mxu0 %v351_v24 }
  0x55   : > { %414 = vmatpush.msra.mxu1 %v389_v25 }
  0x56   : > { %377 = vmatpush.msra.mxu0 %v350_v26 }
  0x57   : > { %415 = vmatpush.msra.mxu1 %v388_v27 }
  0x58   : > { %378 = vmatpush.msra.mxu0 %v349_v28 }
  0x59   : > { %416 = vmatpush.msra.mxu1 %v387_v29 }
  0x5a   : > { %379 = vmatpush.msra.mxu0 %v348_v30 }
  0x5b   : > { %417 = vmatpush.msra.mxu1 %v386_v31  ;;  %380 = vmatmul.f32.vlgmr.msra.gmra.mxu0 %v347_v32 }
  0x5c   : > { %418 = vmatmul.f32.vlgmr.msra.gmra.mxu1 %v385_v33 }
  0xd8   : > { %v381_v34 = vpop.f32.mrf.mxu0 }
  0xd9   : > { %v419_v35 = vpop.f32.mrf.mxu1  ;;  %384 = vst [vmem:[%s339_s10] sm:$0xff] %v381_v34 }
  0xda   : > { %422 = vst [vmem:[%s346_s12] sm:$0xff] %v419_v35 }
  0xdb   : > { %882 = shalt.err (!%p879_p13)
}
  0xdc   : > { %652 = dma.vmem_to_hbm [thread:$0]  (%p1091_p2), %s443_s11, 128, %s445_s13, %s424_s21  }
  0xdd   : > { %s429_s24 = scalar_lea.sflag [#allocation12], %s1117_s16  ;;  %s897_s28 = sshra.s32 %s1158_s15, 4  ;;  %s898_s28 = int_to_ptr.hbm [resolvable:$true] %s897_s28 }
  0xde   : > { %s899_s25 = scalar_lea.hbm %s898_s28, 8  ;;  %s903_s7 = scalar_lea.hbm %s1214_s5, 16 }
  0xdf   : > { %p900_p0 = scmp.ne.s32.totalorder %s898_s28, %s899_s25  ;;  %p904_p8 = scmp.lt.s32.totalorder %s898_s28, %s1214_s5 }
  0xe0   : > { %p905_p1 = scmp.lt.s32.totalorder %s903_s7, %s899_s25 }
  0xe1   : > { %p901_p4 = pnand %p900_p0, %p1091_p2 }
  0xe2   : > { %p906_p3 = por %p905_p1, %p904_p8 }
  0xe3   : > { %p902_p7 = pneg %p901_p4 }
  0xe5   : > { %p907_p9 = pnand %p906_p3, %p902_p7 }
  0xe7   : > { %910 = shalt.err (!%p907_p9)
}
  0xe8   : > { %653 = dma.vmem_to_hbm [thread:$0]  (%p1091_p2), %s458_s17, 128, %s1158_s15, %s429_s24  }
  0xe9 PF: > { %s471_s16 = sand.u32 1, %s961_s18   ;;  %p671_p10 = pnand %p622_p6, %p1098_p5 }
  0xea   : > { %s472_s11 = scalar_lea.sflag [#allocation4], %s471_s16 }
  0xeb   : > { %p672_p11 = pneg %p671_p10 }
  0xed   : > { %952 = dma.done.wait (%p672_p11), %s472_s11, 128  }
  0xee   : > { %954 = vsyncadd (%p672_p11), %s472_s11, 4294967168  ;;  %s482_s12 = scalar_lea.sflag [#allocation12], %s471_s16 }
  0xef   : > { %956 = dma.done.wait (%p672_p11), %s482_s12, 128  }
  0xf0   : > { %958 = vsyncadd (%p672_p11), %s482_s12, 4294967168  ;;  %s29_s23 = sadd.s32 1, %s981_s23   ;;  %s1231_s26 = sld [smem:[#allocation19_spill]] }
  0xf1   : > { %p26_p12 = scmp.ge.s32.totalorder %s29_s23, 4   ;;  %s1232_s20 = sld [smem:[#allocation22_spill]] }
  0xf2   : > { %s1233_s21 = sld [smem:[#allocation20_spill]]  ;;  %s1235_s18 = smov %s965_s19 }
  0xf3   : > { %s1234_s22 = sld [smem:[#allocation21_spill]]  ;;  %28 = sbr.rel (!%p26_p12) target bundleno = 14 (0xe), region = 119 }
  0xf6   : > { %s1236_s19 = smov %s1231_s26 }
  0xf8   :  { %488 = vsyncpa [#allocation3], 1 }
  0xf9   :  { %490 = vsyncpa [#allocation3 + $0x1], 1 }
  0xfa   :  { %491 = vsyncpa [#allocation6], 1 }
  0xfb   :  { %493 = vsyncpa [#allocation6 + $0x1], 1 }
  0xfc   :  { %494 = vsyncpa [#allocation9], 1 }
  0xfd   :  { %495 = vsyncpa [#allocation4], 1 }
  0xfe   :  { %497 = vsyncpa [#allocation4 + $0x1], 1 }
  0xff   :  { %498 = vsyncpa [#allocation12], 1 }
 0x100   :  { %500 = vsyncpa [#allocation12 + $0x1], 1 }

</bundles_post_ra>
